<compile_context>
chip_gen: v6e
topology: v6e:2x2x1
jax: 0.10.0
libtpu: 0.0.40
codegen_flags: <defaults>
</compile_context>

<pallas_src>
import jax
import jax.numpy as jnp
from jax.experimental import pallas as pl
from jax.experimental.pallas import tpu as pltpu

_LANES = 128
_TM_MAX = 4096   # rows per grid step: 4096*128*4B = 2 MiB f32 per input block


def _sublane_multiple(dtype) -> int:
    # f32 tiles are (8,128); sub-32-bit dtypes pack along sublanes:
    # bf16 -> 16 rows, int8/fp8 -> 32 rows.
    return max(8, 32 // jnp.dtype(dtype).itemsize)


def _core_split() -> int:
    """Leading-grid-axis split across TensorCores sharing one JAX device.

    2 on megacore / v7x-style chips, 1 on single-TC chips (v5e / v6e) so they
    do not pay for a duplicate clamped block and a second accumulator init.
    """
    try:
        kind = jax.devices()[0].device_kind.lower()
    except Exception:
        return 2
    if "lite" in kind or "v5e" in kind or "v6e" in kind:
        return 1
    return 2


def masked_mse_loss(pred, target):
    assert pred.ndim == target.ndim, "inconsistent dimensions"
    assert pred.shape == target.shape

    n = pred.size
    rows = pl.cdiv(n, _LANES)
    pad = rows * _LANES - n

    # Keep native dtype (cast to f32 inside the kernel, hidden under DMA).
    p_flat = jnp.reshape(pred, (-1,))
    t_flat = jnp.reshape(target, (-1,))
    if pad:
        # Tiny (<128 element) tail pad; pad target value 0 is masked by (t>0).
        p_flat = jnp.pad(p_flat, (0, pad))
        t_flat = jnp.pad(t_flat, (0, pad))
    p2d = p_flat.reshape(rows, _LANES)
    t2d = t_flat.reshape(rows, _LANES)

    sub = max(_sublane_multiple(pred.dtype), _sublane_multiple(target.dtype))
    tm = min(_TM_MAX, pl.cdiv(rows, sub) * sub)   # multiple of dtype sublane tile
    total_blocks = pl.cdiv(rows, tm)
    ncores = min(_core_split(), total_blocks)
    spc = pl.cdiv(total_blocks, ncores)           # grid steps per core

    def in_index(c, k):
        # Clamp so no block starts past the array end; the clamped duplicate
        # (when a core has fewer real blocks) is masked to zero in-kernel.
        return (jnp.minimum(c * spc + k, total_blocks - 1), 0)

    def kernel(pred_ref, tgt_ref, sum_ref, cnt_ref):
        c = pl.program_id(0)
        k = pl.program_id(1)

        @pl.when(k == 0)
        def _():
            sum_ref[...] = jnp.zeros_like(sum_ref)
            cnt_ref[...] = jnp.zeros_like(cnt_ref)

        t = tgt_ref[...].astype(jnp.float32)
        p = pred_ref[...].astype(jnp.float32)

        # Row-level validity: rows past the end of the (rows,128) array in the
        # partial last block read unspecified data, and whole clamped
        # duplicate blocks must contribute nothing.  One iota + compare + and.
        linear_blk = c * spc + k
        blk = jnp.minimum(linear_blk, total_blocks - 1)
        rows_left = jnp.where(linear_blk < total_blocks, rows - blk * tm, 0)
        row_ids = jax.lax.broadcasted_iota(jnp.int32, (tm, _LANES), 0)

        mask = (t > 0.0) & (row_ids < rows_left)
        d = jnp.where(mask, t - p, 0.0)

        # Reduce the (tm,128) tile over its leading rows into one (8,128)
        # vreg each: pure elementwise VPU adds (no XLU), accumulated straight
        # into the resident output block (output block index is invariant
        # across the k axis, so it acts as the accumulator).
        part_sum = jnp.sum((d * d).reshape(-1, 8, _LANES), axis=0)
        part_cnt = jnp.sum(mask.astype(jnp.int32).reshape(-1, 8, _LANES), axis=0)
        sum_ref[...] += part_sum.reshape(sum_ref.shape)
        cnt_ref[...] += part_cnt.reshape(cnt_ref.shape)

    bytes_accessed = n * (p2d.dtype.itemsize + t2d.dtype.itemsize)
    sums, cnts = pl.pallas_call(
        kernel,
        out_shape=(
            jax.ShapeDtypeStruct((ncores, 8, _LANES), jnp.float32),
            jax.ShapeDtypeStruct((ncores, 8, _LANES), jnp.int32),
        ),
        grid_spec=pltpu.PrefetchScalarGridSpec(
            num_scalar_prefetch=0,
            grid=(ncores, spc),
            in_specs=[
                pl.BlockSpec((tm, _LANES), in_index),
                pl.BlockSpec((tm, _LANES), in_index),
            ],
            out_specs=[
                pl.BlockSpec((1, 8, _LANES), lambda c, k: (c, 0, 0)),
                pl.BlockSpec((1, 8, _LANES), lambda c, k: (c, 0, 0)),
            ],
        ),
        compiler_params=pltpu.CompilerParams(
            dimension_semantics=("parallel", "arbitrary"),
            vmem_limit_bytes=32 * 1024 * 1024,
        ),
        cost_estimate=pl.CostEstimate(
            flops=5 * n, transcendentals=0, bytes_accessed=bytes_accessed),
    )(p2d, t2d)

    total_sum = jnp.sum(sums)
    # int32 count is exact up to ~2.1e9 valid elements.
    total_cnt = jnp.sum(cnts)
    # 0/0 -> NaN when no element is valid (matches torch .mean() of empty sel).
    return total_sum / total_cnt.astype(jnp.float32)


if __name__ == "__main__":
    key = jax.random.PRNGKey(0)
    kp, kt = jax.random.split(key)

    # NCHW inputs; target has a mix of positive / non-positive values so the
    # valid mask is non-trivial.
    shape = (2, 4, 16, 16)
    pred = jax.random.normal(kp, shape, dtype=jnp.float32)
    target = jax.random.normal(kt, shape, dtype=jnp.float32)

    loss = masked_mse_loss(pred, target)
    jax.block_until_ready(loss)

    # pure-JAX reference check
    mask = target > 0
    diff = jnp.where(mask, target - pred, 0.0)
    ref = jnp.sum(diff * diff) / jnp.sum(mask.astype(jnp.float32))
    assert jnp.allclose(loss, ref, rtol=1e-5, atol=1e-6), (loss, ref)

    print("KERNEL_OK")
</pallas_src>

<mosaic_0001>
module attributes {stable_mosaic.version = 11 : i64} {
  func.func @kernel(%arg0: i32, %arg1: i32, %arg2: memref<16x128xf32, #tpu.memory_space<vmem>>, %arg3: memref<16x128xf32, #tpu.memory_space<vmem>>, %arg4: memref<1x8x128xf32, #tpu.memory_space<vmem>>, %arg5: memref<1x8x128xi32, #tpu.memory_space<vmem>>) attributes {dimension_semantics = [#tpu.dimension_semantics<parallel>, #tpu.dimension_semantics<arbitrary>], iteration_bounds = array<i64: 1, 1>, scalar_prefetch = 0 : i64, scratch_operands = 0 : i64, tpu.core_type = #tpu.core_type<tc>, window_params = [{transform_indices = @transform_0, window_bounds = array<i64: 16, 128>}, {transform_indices = @transform_1, window_bounds = array<i64: 16, 128>}, {transform_indices = @transform_2, window_bounds = array<i64: 1, 8, 128>}, {transform_indices = @transform_3, window_bounds = array<i64: 1, 8, 128>}]} {
    %c0_i32 = arith.constant 0 : i32
    %0 = arith.cmpi eq, %arg1, %c0_i32 : i32
    %1 = arith.extui %0 : i1 to i32
    %c0_i32_0 = arith.constant 0 : i32
    %2 = arith.cmpi ne, %1, %c0_i32_0 : i32
    scf.if %2 {
      %cst_23 = arith.constant 0.000000e+00 : f32
      %35 = vector.broadcast %cst_23 : f32 to vector<1x8x128xf32>
      %c0_24 = arith.constant 0 : index
      %c0_25 = arith.constant 0 : index
      %c0_26 = arith.constant 0 : index
      %36 = vector.load %arg4[%c0_24, %c0_25, %c0_26] : memref<1x8x128xf32, #tpu.memory_space<vmem>>, vector<1x8x128xf32>
      tpu.vector_store %arg4[%c0_24, %c0_25, %c0_26], %35 {strides = array<i32>} : memref<1x8x128xf32, #tpu.memory_space<vmem>>, vector<1x8x128xf32>,
      %c0_i32_27 = arith.constant 0 : i32
      %37 = vector.broadcast %c0_i32_27 : i32 to vector<1x8x128xi32>
      %c0_28 = arith.constant 0 : index
      %c0_29 = arith.constant 0 : index
      %c0_30 = arith.constant 0 : index
      %38 = vector.load %arg5[%c0_28, %c0_29, %c0_30] : memref<1x8x128xi32, #tpu.memory_space<vmem>>, vector<1x8x128xi32>
      tpu.vector_store %arg5[%c0_28, %c0_29, %c0_30], %37 {strides = array<i32>} : memref<1x8x128xi32, #tpu.memory_space<vmem>>, vector<1x8x128xi32>,
    } else {
    }
    %c0 = arith.constant 0 : index
    %c0_1 = arith.constant 0 : index
    %3 = vector.load %arg3[%c0, %c0_1] : memref<16x128xf32, #tpu.memory_space<vmem>>, vector<16x128xf32>
    %c0_2 = arith.constant 0 : index
    %c0_3 = arith.constant 0 : index
    %4 = vector.load %arg2[%c0_2, %c0_3] : memref<16x128xf32, #tpu.memory_space<vmem>>, vector<16x128xf32>
    %c1_i32 = arith.constant 1 : i32
    %5 = arith.muli %arg0, %c1_i32 : i32
    %6 = arith.addi %5, %arg1 : i32
    %c0_i32_4 = arith.constant 0 : i32
    %7 = arith.minsi %6, %c0_i32_4 : i32
    %c1_i32_5 = arith.constant 1 : i32
    %8 = arith.cmpi slt, %6, %c1_i32_5 : i32
    %c16_i32 = arith.constant 16 : i32
    %9 = arith.muli %7, %c16_i32 : i32
    %c16_i32_6 = arith.constant 16 : i32
    %10 = arith.subi %c16_i32_6, %9 : i32
    %c0_i32_7 = arith.constant 0 : i32
    %11 = arith.select %8, %10, %c0_i32_7 : i32
    %12 = tpu.iota {dimensions = array<i32: 0>} : vector<16x128xi32>
    %cst = arith.constant 0.000000e+00 : f32
    %13 = vector.broadcast %cst : f32 to vector<16x128xf32>
    %14 = arith.cmpf ogt, %3, %13 : vector<16x128xf32>
    %15 = vector.broadcast %11 : i32 to vector<16x128xi32>
    %16 = arith.cmpi slt, %12, %15 : vector<16x128xi32>
    %17 = arith.andi %14, %16 : vector<16x128xi1>
    %18 = arith.subf %3, %4 : vector<16x128xf32>
    %cst_8 = arith.constant 0.000000e+00 : f32
    %19 = vector.broadcast %cst_8 : f32 to vector<16x128xf32>
    %20 = arith.select %17, %18, %19 : vector<16x128xi1>, vector<16x128xf32>
    %21 = arith.mulf %20, %20 : vector<16x128xf32>
    %22 = vector.shape_cast %21 : vector<16x128xf32> to vector<2x8x128xf32>
    %cst_9 = arith.constant dense<0.000000e+00> : vector<8x128xf32>
    %23 = vector.multi_reduction <add>, %22, %cst_9 [0] : vector<2x8x128xf32> to vector<8x128xf32>
    %24 = arith.extui %17 : vector<16x128xi1> to vector<16x128xi32>
    %25 = vector.shape_cast %24 : vector<16x128xi32> to vector<2x8x128xi32>
    %cst_10 = arith.constant dense<0> : vector<8x128xi32>
    %26 = vector.multi_reduction <add>, %25, %cst_10 [0] : vector<2x8x128xi32> to vector<8x128xi32>
    %c0_11 = arith.constant 0 : index
    %c0_12 = arith.constant 0 : index
    %c0_13 = arith.constant 0 : index
    %27 = vector.load %arg4[%c0_11, %c0_12, %c0_13] : memref<1x8x128xf32, #tpu.memory_space<vmem>>, vector<1x8x128xf32>
    %28 = vector.shape_cast %23 : vector<8x128xf32> to vector<1x8x128xf32>
    %29 = arith.addf %27, %28 : vector<1x8x128xf32>
    %c0_14 = arith.constant 0 : index
    %c0_15 = arith.constant 0 : index
    %c0_16 = arith.constant 0 : index
    %30 = vector.load %arg4[%c0_14, %c0_15, %c0_16] : memref<1x8x128xf32, #tpu.memory_space<vmem>>, vector<1x8x128xf32>
    tpu.vector_store %arg4[%c0_14, %c0_15, %c0_16], %29 {strides = array<i32>} : memref<1x8x128xf32, #tpu.memory_space<vmem>>, vector<1x8x128xf32>,
    %c0_17 = arith.constant 0 : index
    %c0_18 = arith.constant 0 : index
    %c0_19 = arith.constant 0 : index
    %31 = vector.load %arg5[%c0_17, %c0_18, %c0_19] : memref<1x8x128xi32, #tpu.memory_space<vmem>>, vector<1x8x128xi32>
    %32 = vector.shape_cast %26 : vector<8x128xi32> to vector<1x8x128xi32>
    %33 = arith.addi %31, %32 : vector<1x8x128xi32>
    %c0_20 = arith.constant 0 : index
    %c0_21 = arith.constant 0 : index
    %c0_22 = arith.constant 0 : index
    %34 = vector.load %arg5[%c0_20, %c0_21, %c0_22] : memref<1x8x128xi32, #tpu.memory_space<vmem>>, vector<1x8x128xi32>
    tpu.vector_store %arg5[%c0_20, %c0_21, %c0_22], %33 {strides = array<i32>} : memref<1x8x128xi32, #tpu.memory_space<vmem>>, vector<1x8x128xi32>,
    return
  }
  func.func @transform_0(%arg0: i32, %arg1: i32) -> (i32, i32) {
    %c1_i32 = arith.constant 1 : i32
    %0 = arith.muli %arg0, %c1_i32 : i32
    %1 = arith.addi %0, %arg1 : i32
    %c0_i32 = arith.constant 0 : i32
    %2 = arith.minsi %1, %c0_i32 : i32
    %c0_i32_0 = arith.constant 0 : i32
    %c0_i32_1 = arith.constant 0 : i32
    return %2, %c0_i32_0 : i32, i32
  }
  func.func @transform_1(%arg0: i32, %arg1: i32) -> (i32, i32) {
    %c1_i32 = arith.constant 1 : i32
    %0 = arith.muli %arg0, %c1_i32 : i32
    %1 = arith.addi %0, %arg1 : i32
    %c0_i32 = arith.constant 0 : i32
    %2 = arith.minsi %1, %c0_i32 : i32
    %c0_i32_0 = arith.constant 0 : i32
    %c0_i32_1 = arith.constant 0 : i32
    return %2, %c0_i32_0 : i32, i32
  }
  func.func @transform_2(%arg0: i32, %arg1: i32) -> (i32, i32, i32) {
    %c0_i32 = arith.constant 0 : i32
    %c0_i32_0 = arith.constant 0 : i32
    %c0_i32_1 = arith.constant 0 : i32
    return %arg0, %c0_i32, %c0_i32_0 : i32, i32, i32
  }
  func.func @transform_3(%arg0: i32, %arg1: i32) -> (i32, i32, i32) {
    %c0_i32 = arith.constant 0 : i32
    %c0_i32_0 = arith.constant 0 : i32
    %c0_i32_1 = arith.constant 0 : i32
    return %arg0, %c0_i32, %c0_i32_0 : i32, i32, i32
  }
}

</mosaic_0001>

<bundles_post_ra>
// kernel: tpu_custom_call.1
= control target key start
LH: loop header
LB: loop body
LE: loop exit
PB: predicated region body
PF: predicated region fallthrough
CT: control target
= control target key end

     0   :  { %9 = vsyncpa [#allocation3], 0  ;;  %s275_s0 = inlined_call_operand.hbm [shape: f32[16,128], index: 0, kind: input, shape index: {}]   ;;  %s276_s1 = inlined_call_operand.hbm [shape: f32[16,128], index: 1, kind: input, shape index: {}]   ;;  %s277_s2 = inlined_call_operand.hbm [shape: f32[1,8,128], index: 2, kind: output, shape index: {0}]   ;;  %s278_s3 = inlined_call_operand.hbm [shape: s32[1,8,128], index: 3, kind: output, shape index: {1}]  }
   0x1   :  { %10 = vsyncpa [#allocation6], 0 }
   0x2   :  { %11 = vsyncpa [#allocation4], 0 }
   0x3   :  { %12 = vsyncpa [#allocation9], 0  ;;  %s236_s12 = smov [#allocation2]  }
   0x4   :  { %s24_s13 = sshll.u32 %s236_s12, 4  ;;  %s25_s13 = int_to_ptr.vmem [resolvable:$true] %s24_s13 }
   0x5   :  { %s156_s14 = scalar_lea.vmem %s25_s13, 256  ;;  %p161_p1 = scmp.lt.s32.totalorder %s25_s13, %s25_s13 }
   0x6   :  { %p157_p0 = scmp.ne.s32.totalorder %s25_s13, %s156_s14  ;;  %p162_p2 = scmp.lt.s32.totalorder %s156_s14, %s156_s14 }
   0x8   :  { %p163_p3 = por %p162_p2, %p161_p1 }
   0xa   :  { %p164_p4 = pnand %p163_p3, %p157_p0 }
   0xc   :  { %167 = shalt.err (!%p164_p4)
}
   0xd   :  { %s237_s15 = smov 128   ;;  %s238_s16 = smov 8  }
   0xe   :  { %30 = dma.hbm_to_vmem [thread:$0]  %s275_s0, 256, %s25_s13, [#allocation3], %s237_s15, %s237_s15, %s238_s16  }
   0xf   :  { %s239_s19 = smov [#allocation5]  }
  0x10   :  { %s42_s20 = sshll.u32 %s239_s19, 4  ;;  %s43_s20 = int_to_ptr.vmem [resolvable:$true] %s42_s20 }
  0x11   :  { %s176_s21 = scalar_lea.vmem %s43_s20, 256  ;;  %p181_p6 = scmp.lt.s32.totalorder %s43_s20, %s43_s20 }
  0x12   :  { %p177_p5 = scmp.ne.s32.totalorder %s43_s20, %s176_s21  ;;  %p182_p7 = scmp.lt.s32.totalorder %s176_s21, %s176_s21 }
  0x14   :  { %p183_p8 = por %p182_p7, %p181_p6 }
  0x16   :  { %p184_p9 = pnand %p183_p8, %p177_p5 }
  0x18   :  { %187 = shalt.err (!%p184_p9)
}
  0x19   :  { %48 = dma.hbm_to_vmem [thread:$0]  %s276_s1, 256, %s43_s20, [#allocation6], %s237_s15, %s237_s15, %s238_s16  }
  0x1a   :  { %228 = dma.done.wait [#allocation3], 256  }
  0x1b   :  { %229 = vsyncadd [#allocation3], 4294967040 }
  0x1c   :  { %230 = dma.done.wait [#allocation6], 256  }
  0x1d   :  { %231 = vsyncadd [#allocation6], 4294967040  ;;  %v69_v0 = vld [vmem:[#allocation5] sm:$0xff]  ;;  %v70_v1 = vld [vmem:[#allocation5 + $0x8] sm:$0xff]  ;;  %v240_v6 = vmov 0   ;;  %s241_s0 = smov [#allocation8]  }
  0x1e   :  { %v71_v2 = vld [vmem:[#allocation2] sm:$0xff]  ;;  %v72_v3 = vld [vmem:[#allocation2 + $0x8] sm:$0xff]  ;;  %vm83_vm0 = vcmp.gt.f32.partialorder %v69_v0, 0.0  ;;  %vm84_vm1 = vcmp.gt.f32.partialorder %v70_v1, 0.0  ;;  %s122_s24 = sshll.u32 %s241_s0, 4  ;;  %s242_s1 = smov [#allocation7]   ;;  %s123_s24 = int_to_ptr.vmem [resolvable:$true] %s122_s24 }
  0x1f   :  { %v90_v4 = vsub.f32 %v69_v0, %v71_v2  ;;  %v91_v5 = vsub.f32 %v70_v1, %v72_v3  ;;  %v97_v7 = vsel %vm83_vm0, 1, %v240_v6  ;;  %v98_v8 = vsel %vm84_vm1, 1, %v240_v6  ;;  %s112_s25 = sshll.u32 %s242_s1, 4  ;;  %s188_s26 = scalar_lea.vmem %s123_s24, 128  ;;  %s113_s25 = int_to_ptr.vmem [resolvable:$true] %s112_s25 }
  0x20   :  { %v99_v10 = vadd.s32 %v98_v8, %v97_v7  ;;  %p189_p10 = scmp.ne.s32.totalorder %s123_s24, %s188_s26  ;;  %p193_p11 = scmp.lt.s32.totalorder %s123_s24, %s123_s24 }
  0x21   :  { %v92_v9 = vsel %vm83_vm0, %v90_v4, 0.0  ;;  %v93_v11 = vsel %vm84_vm1, %v91_v5, 0.0  ;;  %p194_p12 = scmp.lt.s32.totalorder %s188_s26, %s188_s26 }
  0x22   :  { %v94_v12 = vmul.f32 %v92_v9, %v92_v9  ;;  %v95_v13 = vmul.f32 %v93_v11, %v93_v11  ;;  %105 = vst [vmem:[#allocation8] sm:$0xff] %v99_v10 }
  0x23   :  { %p195_p13 = por %p194_p12, %p193_p11 }
  0x24   :  { %v96_v14 = vadd.f32 %v95_v13, %v94_v12 }
  0x25   :  { %p196_p0 = pnand %p195_p13, %p189_p10 }
  0x27   :  { %199 = shalt.err (!%p196_p0)
}
  0x28   :  { %125 = dma.vmem_to_hbm [thread:$0]  %s123_s24, 128, %s278_s3, [#allocation9]   ;;  %102 = vst [vmem:[#allocation7] sm:$0xff] %v96_v14 }
  0x29   :  { %s208_s29 = scalar_lea.vmem %s113_s25, 128  ;;  %p213_p2 = scmp.lt.s32.totalorder %s113_s25, %s113_s25 }
  0x2a   :  { %p209_p1 = scmp.ne.s32.totalorder %s113_s25, %s208_s29  ;;  %p214_p3 = scmp.lt.s32.totalorder %s208_s29, %s208_s29 }
  0x2c   :  { %p215_p4 = por %p214_p3, %p213_p2 }
  0x2e   :  { %p216_p5 = pnand %p215_p4, %p209_p1 }
  0x30   :  { %219 = shalt.err (!%p216_p5)
}
  0x31   :  { %115 = dma.vmem_to_hbm [thread:$0]  %s113_s25, 128, %s277_s2, [#allocation4]  }
  0x32   :  { %232 = dma.done.wait [#allocation4], 128  }
  0x33   :  { %233 = vsyncadd [#allocation4], 4294967168 }
  0x34   :  { %234 = dma.done.wait [#allocation9], 128  }
  0x35   :  { %235 = vsyncadd [#allocation9], 4294967168 }
  0x36   :  { %132 = vsyncpa [#allocation3], 1 }
  0x37   :  { %133 = vsyncpa [#allocation6], 1 }
  0x38   :  { %134 = vsyncpa [#allocation4], 1 }
  0x39   :  { %135 = vsyncpa [#allocation9], 1 }

</bundles_post_ra>
